<compile_context>
chip_gen: v7x
topology: tpu7x:2x2x1
jax: 0.10.0
libtpu: 0.0.40
codegen_flags: <defaults>
</compile_context>

<pallas_src>
import functools

import jax
import jax.numpy as jnp
from jax.experimental import pallas as pl
from jax.experimental.pallas import tpu as pltpu


def _label_smoothing_kernel(logits_ref, target_ref, out_ref, *,
                            smoothing, n_total, block_rows, ragged):
    i = pl.program_id(0)

    x = logits_ref[...].astype(jnp.float32)              # (TN, C) f32 compute
    t = target_ref[...]                                  # (TN, 1) int32
    tn, c = x.shape

    # Numerically stable logsumexp; only the exp path needs a (TN,C) f32 temp.
    m = jnp.max(x, axis=-1, keepdims=True)                                # (TN,1)
    lse = m + jnp.log(jnp.sum(jnp.exp(x - m), axis=-1, keepdims=True))    # (TN,1)
    sum_x = jnp.sum(x, axis=-1, keepdims=True)                            # (TN,1)

    # x at the target class, gathered via a broadcast compare against a (1,C)
    # lane iota (no (TN,C) iota / one-hot materialized).
    col = jax.lax.broadcasted_iota(jnp.int32, (1, c), 1)                  # (1,C)
    x_t = jnp.sum(jnp.where(col == t, x, 0.0), axis=-1, keepdims=True)    # (TN,1)

    off = smoothing / (c - 1)
    on_minus_off = (1.0 - smoothing) - off
    # Folded smoothed-CE:  off*C + (1 - s - off) == 1  =>
    #   loss_row = logsumexp(x) - off*sum(x) - (1 - s - off)*x_t
    loss_rows = lse - off * sum_x - on_minus_off * x_t                    # (TN,1)

    if ragged:
        # Mask rows past the true batch size (only compiled when N % TN != 0).
        # Cheap: two ops on a (TN,1) column.
        row = i * block_rows + jax.lax.broadcasted_iota(jnp.int32, (tn, 1), 0)
        loss_rows = jnp.where(row < n_total, loss_rows, 0.0)

    # Per-tile partial sum -> lane 0 of this tile's private (1,1,128) block.
    partial = jnp.sum(loss_rows)                                          # scalar
    lane = jax.lax.broadcasted_iota(jnp.int32, out_ref.shape, 2)          # (1,1,128)
    out_ref[...] = jnp.where(lane == 0, partial, 0.0)


def label_smoothing_loss(logits, target, smoothing=0.0, block_rows=None):
    """logits: (N, C) float (f32 or bf16), target: (N,) int. Scalar f32 loss."""
    assert 0.0 <= smoothing < 1.0
    n, c = logits.shape
    assert c > 1, "label smoothing needs at least 2 classes (off = s / (C-1))"
    target2d = target.astype(jnp.int32).reshape(n, 1)

    itemsize = jnp.dtype(logits.dtype).itemsize

    # Per-generation VMEM capacity (v5e/v6e 128 MiB, v7x 64 MiB per TC).
    try:
        vmem_cap = int(pltpu.get_tpu_info().vmem_capacity_bytes)
    except Exception:                                     # pragma: no cover
        vmem_cap = 64 * 1024 * 1024                       # conservative (v7x)

    # Per-row VMEM footprint:
    #   2x double-buffered ingress logits tile      : 2 * C * itemsize
    #   ~6 f32 (TN, C) compute intermediates        : 6 * C * 4
    #   2x double-buffered lane-padded target tile  : 2 * 128 * 4
    per_row_bytes = 2 * c * itemsize + 6 * c * 4 + 2 * 128 * 4

    if block_rows is None:
        # Largest tile that fits comfortably: keep total kernel VMEM well
        # under the physical capacity (3/8 of it, capped at 48 MiB).
        budget_bytes = min(vmem_cap * 3 // 8, 48 * 1024 * 1024)
        block_rows = max(16, (budget_bytes // per_row_bytes) // 16 * 16)
    if block_rows >= n:
        block_rows = n                                    # single full-batch tile
    else:
        block_rows = max(16, (block_rows // 16) * 16)     # bf16 (16,128)-safe

    n_tiles = pl.cdiv(n, block_rows)
    ragged = (n % block_rows) != 0

    # Raise the scoped-VMEM limit to cover the chosen tile (v5e default is
    # only 16 MiB scoped; physical is 128 MiB), with headroom below physical.
    est_bytes = block_rows * per_row_bytes + (2 << 20)
    vmem_limit_bytes = int(min(vmem_cap - (8 << 20),
                               max(2 * est_bytes, 32 << 20)))

    kernel = functools.partial(
        _label_smoothing_kernel,
        smoothing=float(smoothing),
        n_total=n,
        block_rows=block_rows,
        ragged=ragged,
    )

    cost = pl.CostEstimate(
        flops=6 * n * c,
        transcendentals=n * c,
        bytes_accessed=n * c * itemsize + n * 4 + n_tiles * 128 * 4,
    )

    partials = pl.pallas_call(
        kernel,
        out_shape=jax.ShapeDtypeStruct((n_tiles, 1, 128), jnp.float32),
        grid=(n_tiles,),
        in_specs=[
            pl.BlockSpec((block_rows, c), lambda i: (i, 0)),
            pl.BlockSpec((block_rows, 1), lambda i: (i, 0)),
        ],
        out_specs=pl.BlockSpec((1, 1, 128), lambda i: (i, 0, 0)),
        compiler_params=pltpu.CompilerParams(
            dimension_semantics=("parallel",),            # independent tiles
            vmem_limit_bytes=vmem_limit_bytes,
        ),
        cost_estimate=cost,
    )(logits, target2d)

    # Tiny final reduction + mean over the *global* batch size in plain JAX.
    return jnp.sum(partials) / n


def _reference(logits, target, smoothing):
    n, c = logits.shape
    onehot = jax.nn.one_hot(target, c, dtype=jnp.float32)
    tgt = onehot * (1.0 - smoothing) + (1.0 - onehot) * (smoothing / (c - 1))
    lsm = jax.nn.log_softmax(logits.astype(jnp.float32), axis=-1)
    return jnp.mean(-jnp.sum(tgt * lsm, axis=-1))


if __name__ == "__main__":
    key = jax.random.PRNGKey(0)
    k1, k2 = jax.random.split(key)

    N, C = 64, 128
    smoothing = 0.1

    logits = jax.random.normal(k1, (N, C), dtype=jnp.float32)
    target = jax.random.randint(k2, (N,), 0, C, dtype=jnp.int32)

    # Multi-tile path: 4 parallel row tiles, per-tile partials summed outside.
    loss = label_smoothing_loss(logits, target, smoothing=smoothing, block_rows=16)
    loss = jax.block_until_ready(loss)
    ref = _reference(logits, target, smoothing)
    assert jnp.allclose(loss, ref, atol=1e-5, rtol=1e-5), (loss, ref)

    # Auto tile sizing (single full-batch tile at this small N).
    loss_auto = label_smoothing_loss(logits, target, smoothing=smoothing)
    loss_auto = jax.block_until_ready(loss_auto)
    assert jnp.allclose(loss_auto, ref, atol=1e-5, rtol=1e-5), (loss_auto, ref)

    # Ragged last tile: N not a multiple of the row tile -> in-kernel masking.
    loss2 = label_smoothing_loss(logits[:50], target[:50],
                                 smoothing=smoothing, block_rows=16)
    loss2 = jax.block_until_ready(loss2)
    ref2 = _reference(logits[:50], target[:50], smoothing)
    assert jnp.allclose(loss2, ref2, atol=1e-5, rtol=1e-5), (loss2, ref2)

    # bf16 ingress (halves HBM traffic; the preferred path on v5e/v6e),
    # f32 math inside the kernel.
    logits_bf16 = logits.astype(jnp.bfloat16)
    loss3 = label_smoothing_loss(logits_bf16, target,
                                 smoothing=smoothing, block_rows=16)
    loss3 = jax.block_until_ready(loss3)
    ref3 = _reference(logits_bf16.astype(jnp.float32), target, smoothing)
    assert jnp.allclose(loss3, ref3, atol=1e-4, rtol=1e-4), (loss3, ref3)

    print("KERNEL_OK")
</pallas_src>

<mosaic_0001>
module attributes {stable_mosaic.version = 11 : i64} {
  func.func @_label_smoothing_kernel(%arg0: i32, %arg1: memref<16x128xf32, #tpu.memory_space<vmem>>, %arg2: memref<16x1xi32, #tpu.memory_space<vmem>>, %arg3: memref<1x1x128xf32, #tpu.memory_space<vmem>>) attributes {dimension_semantics = [#tpu.dimension_semantics<parallel>], iteration_bounds = array<i64: 4>, scalar_prefetch = 0 : i64, scratch_operands = 0 : i64, tpu.core_type = #tpu.core_type<tc>, window_params = [{transform_indices = @transform_0, window_bounds = array<i64: 16, 128>}, {transform_indices = @transform_1, window_bounds = array<i64: 16, 1>}, {transform_indices = @transform_2, window_bounds = array<i64: 1, 1, 128>}]} {
    %c0 = arith.constant 0 : index
    %c0_0 = arith.constant 0 : index
    %0 = vector.load %arg1[%c0, %c0_0] : memref<16x128xf32, #tpu.memory_space<vmem>>, vector<16x128xf32>
    %c0_1 = arith.constant 0 : index
    %c0_2 = arith.constant 0 : index
    %1 = vector.load %arg2[%c0_1, %c0_2] : memref<16x1xi32, #tpu.memory_space<vmem>>, vector<16x1xi32>
    %cst = arith.constant dense<0xFF800000> : vector<16xf32>
    %2 = vector.multi_reduction <maximumf>, %0, %cst [1] : vector<16x128xf32> to vector<16xf32>
    %3 = vector.shape_cast %2 : vector<16xf32> to vector<16x1xf32>
    %4 = vector.broadcast %3 : vector<16x1xf32> to vector<16x128xf32>
    %5 = arith.subf %0, %4 : vector<16x128xf32>
    %6 = math.exp %5 : vector<16x128xf32>
    %cst_3 = arith.constant dense<0.000000e+00> : vector<16xf32>
    %7 = vector.multi_reduction <add>, %6, %cst_3 [1] : vector<16x128xf32> to vector<16xf32>
    %8 = vector.shape_cast %7 : vector<16xf32> to vector<16x1xf32>
    %9 = math.log %8 : vector<16x1xf32>
    %10 = arith.addf %3, %9 : vector<16x1xf32>
    %cst_4 = arith.constant dense<0.000000e+00> : vector<16xf32>
    %11 = vector.multi_reduction <add>, %0, %cst_4 [1] : vector<16x128xf32> to vector<16xf32>
    %12 = vector.shape_cast %11 : vector<16xf32> to vector<16x1xf32>
    %13 = tpu.iota {dimensions = array<i32: 1>} : vector<1x128xi32>
    %14 = vector.broadcast %13 : vector<1x128xi32> to vector<16x128xi32>
    %15 = vector.broadcast %1 : vector<16x1xi32> to vector<16x128xi32>
    %16 = arith.cmpi eq, %14, %15 : vector<16x128xi32>
    %cst_5 = arith.constant 0.000000e+00 : f32
    %17 = vector.broadcast %cst_5 : f32 to vector<16x128xf32>
    %18 = arith.select %16, %0, %17 : vector<16x128xi1>, vector<16x128xf32>
    %cst_6 = arith.constant dense<0.000000e+00> : vector<16xf32>
    %19 = vector.multi_reduction <add>, %18, %cst_6 [1] : vector<16x128xf32> to vector<16xf32>
    %20 = vector.shape_cast %19 : vector<16xf32> to vector<16x1xf32>
    %cst_7 = arith.constant 7.87401571E-4 : f32
    %21 = vector.broadcast %cst_7 : f32 to vector<16x1xf32>
    %22 = arith.mulf %21, %12 : vector<16x1xf32>
    %23 = arith.subf %10, %22 : vector<16x1xf32>
    %cst_8 = arith.constant 0.899212599 : f32
    %24 = vector.broadcast %cst_8 : f32 to vector<16x1xf32>
    %25 = arith.mulf %24, %20 : vector<16x1xf32>
    %26 = arith.subf %23, %25 : vector<16x1xf32>
    %27 = vector.shape_cast %26 : vector<16x1xf32> to vector<1x16x1xf32>
    %cst_9 = arith.constant dense<0.000000e+00> : vector<1xf32>
    %28 = vector.multi_reduction <add>, %27, %cst_9 [1, 2] : vector<1x16x1xf32> to vector<1xf32>
    %29 = vector.shape_cast %28 : vector<1xf32> to vector<1x1x1xf32>
    %30 = vector.extract %29[0, 0, 0] : f32 from vector<1x1x1xf32>
    %31 = tpu.iota {dimensions = array<i32: 2>} : vector<1x1x128xi32>
    %c0_i32 = arith.constant 0 : i32
    %32 = vector.broadcast %c0_i32 : i32 to vector<1x1x128xi32>
    %33 = arith.cmpi eq, %31, %32 : vector<1x1x128xi32>
    %cst_10 = arith.constant 0.000000e+00 : f32
    %34 = vector.broadcast %30 : f32 to vector<1x1x128xf32>
    %35 = vector.broadcast %cst_10 : f32 to vector<1x1x128xf32>
    %36 = arith.select %33, %34, %35 : vector<1x1x128xi1>, vector<1x1x128xf32>
    %c0_11 = arith.constant 0 : index
    %c0_12 = arith.constant 0 : index
    %c0_13 = arith.constant 0 : index
    %37 = vector.load %arg3[%c0_11, %c0_12, %c0_13] : memref<1x1x128xf32, #tpu.memory_space<vmem>>, vector<1x1x128xf32>
    tpu.vector_store %arg3[%c0_11, %c0_12, %c0_13], %36 {strides = array<i32>} : memref<1x1x128xf32, #tpu.memory_space<vmem>>, vector<1x1x128xf32>,
    return
  }
  func.func @transform_0(%arg0: i32) -> (i32, i32) {
    %c0_i32 = arith.constant 0 : i32
    %c0_i32_0 = arith.constant 0 : i32
    return %arg0, %c0_i32 : i32, i32
  }
  func.func @transform_1(%arg0: i32) -> (i32, i32) {
    %c0_i32 = arith.constant 0 : i32
    %c0_i32_0 = arith.constant 0 : i32
    return %arg0, %c0_i32 : i32, i32
  }
  func.func @transform_2(%arg0: i32) -> (i32, i32, i32) {
    %c0_i32 = arith.constant 0 : i32
    %c0_i32_0 = arith.constant 0 : i32
    %c0_i32_1 = arith.constant 0 : i32
    return %arg0, %c0_i32, %c0_i32_0 : i32, i32, i32
  }
}

</mosaic_0001>

<bundles_post_ra>
// kernel: tpu_custom_call.1
= control target key start
LH: loop header
LB: loop body
LE: loop exit
PB: predicated region body
PF: predicated region fallthrough
CT: control target
= control target key end

     0   :  { %7 = vsyncpa [#allocation3], 0  ;;  %s560_s0 = inlined_call_operand.vmem [shape: f32[64,128], index: 0, kind: input, shape index: {}]   ;;  %s561_s1 = inlined_call_operand.vmem [shape: s32[64,1], index: 1, kind: input, shape index: {}]   ;;  %s562_s2 = inlined_call_operand.hbm [shape: f32[4,1,128], index: 2, kind: output, shape index: {}]  }
   0x1   :  { %9 = vsyncpa [#allocation3 + $0x1], 0  ;;  %s458_s9 = smov 0   ;;  %s460_s10 = smov 0  }
   0x2   :  { %s462_s11 = smov 0   ;;  %s464_s12 = smov 0  }
   0x3 LB: > { %s479_s13 = sadd.s32 4294967295, %s439_s12   ;;  %s314_s14 = sadd.s32 4294967294, %s439_s12   ;;  %s439_s12 = sphi %s464_s12, %s568_s12   ;;  %s435_s11 = sphi %s462_s11, %s567_s11   ;;  %s431_s10 = sphi %s460_s10, %s566_s10   ;;  %s427_s9 = sphi %s458_s9, %s565_s9  }
   0x4   : > { %s483_s15 = sadd.s32 1, %s439_s12   ;;  %s74_s16 = sadd.s32 1, %s435_s11 }
   0x5   : > { %s71_s17 = ssub.s32 %s439_s12, %s483_s15  ;;  %p84_p0 = scmp.ne.s32.totalorder %s435_s11, %s431_s10 }
   0x6   : > { %p72_p1 = scmp.eq.s32.totalorder %s71_s17, 0  ;;  %p85_p2 = scmp.eq.s32.totalorder %s479_s13, 3 }
   0x7   : > { %p90_p3 = scmp.ne.s32.totalorder %s431_s10, %s427_s9  ;;  %p91_p4 = scmp.eq.s32.totalorder %s314_s14, 3 }
   0x8   : > { %s494_s18 = scalar_select %p72_p1, %s435_s11, %s74_s16  }
   0x9   : > { %p496_p5 = por %p85_p2, %p84_p0  ;;  %p500_p6 = por %p91_p4, %p90_p3 }
   0xa   : > { %p317_p7 = scmp.ge.s32.totalorder %s439_s12, 1  ;;  %p127_p8 = scmp.lt.s32.totalorder %s439_s12, 5 }
   0xc   : > { %p128_p9 = pnand %p317_p7, %p127_p8 }
   0xd   : > { %s318_s21 = sshll.u32 (!%p128_p9), %s479_s13, 1  ;;  %v441_v0 = vmov (!%p128_p9), 0   ;;  %v193_v11 = vlaneseq (!%p128_p9)  ;;  %vm217_vm2 = vcmask (!%p128_p9), 7168   ;;  %s151_s29 = sand.u32 (!%p128_p9), 1, %s431_s10  }
   0xe   : > { %131 = sbr.rel (%p128_p9) target bundleno = 570 (0x23a), region = 28  ;;  %p154_p10 = scmp.lt.s32.totalorder (!%p128_p9), %s318_s21, 7  ;;  %367 = vset.pattern.permute.xlu1 (!%p128_p9), %v441_v0  ;;  %368 = vset.pattern.permute.xlu0 (!%p128_p9), %v441_v0 }
   0xf   : > { %v194_v14 = vand.u32 (!%p128_p9), 127, %v193_v11  ;;  %s322_s30 = sshll.u32 (!%p128_p9), %s479_s13, 4  ;;  %s152_s3 = scalar_lea.vmem (!%p128_p9), [#allocation2], %s151_s29 }
  0x10   : > { %s247_s4 = sshll.u32 (!%p128_p9), %s152_s3, 4  ;;  %s518_s8 = scalar_lea.hbm (!%p128_p9), %s562_s2, %s322_s30  ;;  %s520_s4 = int_to_ptr.vmem [resolvable:$true] %s247_s4 }
  0x11   : > { %vm230_vm3 = vcmp.eq.s32.totalorder (!%p128_p9), %v194_v14, 0  ;;  %s235_s14 = scalar_lea.sflag (!%p128_p9), [#allocation3], %s151_s29  ;;  %s377_s16 = scalar_lea.vmem (!%p128_p9), %s520_s4, 16 }
  0x12   : > { %p378_p11 = scmp.ne.s32.totalorder (!%p128_p9), %s520_s4, %s377_s16  ;;  %s442_s13 = smov (!%p128_p9), [#allocation2]  }
  0x13   : > { %s381_s17 = sshll.u32 (!%p128_p9), %s442_s13, 4  ;;  %s382_s17 = int_to_ptr.vmem [resolvable:$false] %s381_s17 }
  0x14   : > { %p379_p12 = pnand (!%p128_p9), %p378_p11, %p496_p5  ;;  %p384_p0 = scmp.lt.s32.totalorder (!%p128_p9), %s520_s4, %s382_s17 }
  0x15   : > { %s570_s21 = smov (!%p154_p10, %s318_s21), 7 }
  0x16   : > { %s319_s22 = sshll.u32 %s570_s21, 3  ;;  %p380_p13 = pneg %p379_p12 }
  0x17   : > { %s157_s25 = scalar_lea.vmem %s560_s0, %s319_s22  ;;  %s163_s28 = scalar_lea.vmem %s561_s1, %s319_s22 }
  0x18   : > { %v165_v1 = vld [vmem:[%s157_s25] sm:$0xff]  ;;  %v166_v3 = vld [vmem:[%s157_s25 + $0x8] sm:$0xff]  ;;  %s383_s21 = scalar_lea.vmem %s382_s17, 32 }
  0x19   : > { %v167_v2 = vld [vmem:[%s163_s28] sm:$0xff]  ;;  %169 = vmax.xlane.f32.xlu0 %v165_v1  ;;  %v168_v4 = vld [vmem:[%s163_s28 + $0x8] sm:$0xff]  ;;  %p385_p1 = scmp.lt.s32.totalorder %s383_s21, %s377_s16 }
  0x1a   : > { %196 = vperm.xlu1 %367, %v167_v2  }
  0x1b   : > { %p386_p2 = por %p385_p1, %p384_p0 }
  0x1d   : > { %171 = vmax.xlane.f32.xlu0 %v166_v3  ;;  %p387_p3 = pnand %p386_p2, %p380_p13 }
  0x1e   : > { %199 = vperm.xlu1 %367, %v168_v4  }
  0x99   : > { %v197_v13 = vpop.permute.xlu1 %196 }
  0x9a   : > { %vm201_vm0 = vcmp.eq.s32.totalorder %v194_v14, %v197_v13 }
  0x9b   : > { %v203_v17 = vsel %vm201_vm0, %v165_v1, 0.0 }
  0x9d   : > { %v200_v16 = vpop.permute.xlu1 %199 }
  0x9e   : > { %vm202_vm1 = vcmp.eq.s32.totalorder %v194_v14, %v200_v16 }
  0x9f   : > { %v204_v18 = vsel %vm202_vm1, %v166_v3, 0.0 }
  0xa6   : > { %v170_v5 = vpop.xlane.xlu0 %169 }
  0xa7   : > { %v173_v6 = vsub.f32 %v165_v1, %v170_v5 }
  0xa9   : > { %v175_v7 = vmul.f32 1.442695, %v173_v6 }
  0xaa   : > { %v172_v8 = vpop.xlane.xlu0 %171 }
  0xab   : > { %369 = vpow2.f32 %v175_v7  ;;  %v174_v9 = vsub.f32 %v166_v3, %v172_v8 }
  0xad   : > { %v177_v10 = vmul.f32 1.442695, %v174_v9 }
  0xaf   : > { %371 = vpow2.f32 %v177_v10 }
  0xb5   : > { %v370_v12 = vpop.eup %369 }
  0xb6   : > { %179 = vadd.xlane.f32.xlu0 %v370_v12 }
  0xb9   : > { %v372_v15 = vpop.eup %371 }
  0xba   : > { %189 = vadd.xlane.f32.xlu0 %v165_v1  ;;  %181 = vadd.xlane.f32.xlu1 %v372_v15 }
  0xbe   : > { %191 = vadd.xlane.f32.xlu0 %v166_v3 }
  0xc2   : > { %205 = vadd.xlane.f32.xlu0 %v203_v17 }
  0xc6   : > { %207 = vadd.xlane.f32.xlu0 %v204_v18 }
 0x143   : > { %v180_v19 = vpop.xlane.xlu0 %179 }
 0x144   : > { %373 = vlog2.f32 %v180_v19 }
 0x147   : > { %v182_v20 = vpop.xlane.xlu1 %181  ;;  %v190_v21 = vpop.xlane.xlu0 %189 }
 0x148   : > { %375 = vlog2.f32 %v182_v20  ;;  %v209_v27 = vmul.f32 0.0007874016, %v190_v21 }
 0x14b   : > { %v192_v22 = vpop.xlane.xlu0 %191 }
 0x14c   : > { %v210_v34 = vmul.f32 0.0007874016, %v192_v22 }
 0x14e   : > { %v374_v23 = vpop.eup %373 }
 0x14f   : > { %v184_v24 = vmul.f32 0.6931472, %v374_v23  ;;  %v206_v25 = vpop.xlane.xlu0 %205 }
 0x150   : > { %v213_v31 = vmul.f32 0.8992126, %v206_v25 }
 0x151   : > { %v187_v26 = vadd.f32 %v184_v24, %v170_v5 }
 0x152   : > { %v376_v28 = vpop.eup %375 }
 0x153   : > { %v186_v29 = vmul.f32 0.6931472, %v376_v28  ;;  %v211_v30 = vsub.f32 %v187_v26, %v209_v27  ;;  %v208_v32 = vpop.xlane.xlu0 %207 }
 0x154   : > { %v214_v37 = vmul.f32 0.8992126, %v208_v32 }
 0x155   : > { %v188_v33 = vadd.f32 %v186_v29, %v172_v8  ;;  %v215_v36 = vsub.f32 %v211_v30, %v213_v31 }
 0x157   : > { %v212_v35 = vsub.f32 %v188_v33, %v210_v34  ;;  %v218_v39 = vsel %vm217_vm2, %v215_v36, 0.0 }
 0x159   : > { %v216_v38 = vsub.f32 %v212_v35, %v214_v37 }
 0x15b   : > { %v219_v40 = vsel %vm217_vm2, %v216_v38, 0.0 }
 0x15c   : > { %v220_v41 = vadd.f32 %v219_v40, %v218_v39 }
 0x15e   : > { %221 = vadd.xlane.f32.xlu0 %v220_v41 }
 0x1eb   : > { %v222_v42 = vpop.xlane.xlu0 %221 }
 0x1ec   : > { %v223_v43 = vrot.slane %v222_v42, 4 }
 0x1ee   : > { %v224_v44 = vadd.f32 %v223_v43, %v222_v42 }
 0x1f0   : > { %v225_v45 = vrot.slane %v224_v44, 2 }
 0x1f2   : > { %v226_v46 = vadd.f32 %v225_v45, %v224_v44 }
 0x1f4   : > { %v227_v47 = vrot.slane %v226_v46, 1 }
 0x1f6   : > { %v228_v48 = vadd.f32 %v227_v47, %v226_v46 }
 0x1f8   : > { %325 = vpush %v228_v48 }
 0x229   : > { %s326_s5 = spop %325 }
 0x22a   : > { %v231_v49 = vstv %s326_s5 }
 0x22b   : > { %v232_v50 = vsel %vm230_vm3, %v231_v49, 0.0 }
 0x22c   : > { %233 = vst [vmem:[%s152_s3] sm:$0x1] %v232_v50 }
 0x22d   : > { %390 = shalt.err (!%p387_p3)
}
 0x22e   : > { %s391_s22 = scalar_lea.hbm %s518_s8, 16  ;;  %s395_s25 = scalar_lea.hbm %s562_s2, 64 }
 0x22f   : > { %p392_p4 = scmp.ne.s32.totalorder %s518_s8, %s391_s22  ;;  %p396_p9 = scmp.lt.u32.totalorder %s518_s8, %s562_s2 }
 0x230   : > { %p397_p10 = scmp.lt.u32.totalorder %s395_s25, %s391_s22  ;;  %p399_p12 = scmp.lt.u32.totalorder %s391_s22, %s518_s8 }
 0x231   : > { %p393_p7 = pnand %p392_p4, %p496_p5 }
 0x232   : > { %p398_p11 = por %p397_p10, %p396_p9 }
 0x233   : > { %p394_p8 = pneg %p393_p7 }
 0x234   : > { %p400_p13 = por %p399_p12, %p398_p11 }
 0x236   : > { %p401_p0 = pnand %p400_p13, %p394_p8 }
 0x238   : > { %404 = shalt.err (!%p401_p0)
}
 0x239   : > { %327 = dma.vmem_to_hbm [thread:$0]  (%p496_p5), %s520_s4, 16, %s518_s8, %s235_s14  }
 0x23a PF: > { %p333_p1 = scmp.ge.s32.totalorder %s439_s12, 2  ;;  %s259_s28 = sand.u32 1, %s427_s9  }
 0x23b   : > { %s260_s29 = scalar_lea.sflag [#allocation3], %s259_s28 }
 0x23c   : > { %p330_p2 = pnand %p333_p1, %p500_p6 }
 0x23e   : > { %422 = dma.done.wait (!%p330_p2), %s260_s29, 16  }
 0x23f   : > { %424 = vsyncadd (!%p330_p2), %s260_s29, 4294967280  ;;  %p12_p3 = scmp.ge.s32.totalorder %s483_s15, 6   ;;  %s565_s9 = smov %s431_s10 }
 0x240   : > { %s566_s10 = smov %s435_s11  ;;  %s567_s11 = smov %s494_s18 }
 0x241   : > { %s568_s12 = smov %s483_s15  ;;  %14 = sbr.rel (!%p12_p3) target bundleno = 3 (0x3), region = 66 }
 0x248   :  { %264 = vsyncpa [#allocation3], 1 }
 0x249   :  { %266 = vsyncpa [#allocation3 + $0x1], 1 }

</bundles_post_ra>
